<compile_context>
chip_gen: v7x
topology: tpu7x:2x2x1
jax: 0.10.0
libtpu: 0.0.40
codegen_flags: <defaults>
</compile_context>

<pallas_src>
import math
from functools import partial

import jax
import jax.numpy as jnp
from jax.experimental import pallas as pl
from jax.experimental.pallas import tpu as pltpu

NEG_SLOPE = 0.01  # torch.nn.LeakyReLU default


def _round_up(x, m):
    return ((x + m - 1) // m) * m


def _facconv_kernel(x_ref, w1_ref, w2_ref, b1_ref, b2_ref, mask_ref, o_ref,
                    y1_scr, *, K, C_in, C_mid, Wp, W1, L_out):
    # x_ref: (C_in, Hp*Wp)  one batch element, H-major flat, padded in H and W.
    # w1_ref: (C_mid, K*C_in)  columns ordered (kh, ci)
    # w2_ref: (C_out, K*C_mid) columns ordered (kw, cm)
    # b1_ref: (C_mid, 1), b2_ref: (C_out, 1), mask_ref: (1, W1)
    # o_ref: (C_out, L_out) lane-dense output slab (L_out % 128 == 0)
    # y1_scr: (C_mid, L_out + K - 1) VMEM scratch.

    # ---- stage 1: Conv(Kx1) along H as K accumulated MXU matmuls -------------
    # The tap-kh window is a contiguous lane slice because every W column of the
    # padded image is present in the flat layout.
    acc1 = jnp.zeros((C_mid, W1), jnp.float32)
    for kh in range(K):
        xs = x_ref[:, kh * Wp: kh * Wp + W1]                  # (C_in, W1)
        w1k = w1_ref[:, kh * C_in: (kh + 1) * C_in]           # (C_mid, C_in)
        acc1 = acc1 + jnp.dot(w1k.astype(jnp.float32),
                              xs.astype(jnp.float32),
                              preferred_element_type=jnp.float32)
    # Add bias1, then force the W-padding columns back to exact zero so stage 2
    # sees true zero padding (conv1 over an all-zero column + bias would be b1).
    y1 = (acc1 + b1_ref[...]) * mask_ref[...]

    # ---- stash y1 in VMEM scratch so stage-2 taps are contiguous slices ------
    S = y1_scr.shape[1]
    if S > W1:
        y1_scr[:, W1:] = jnp.zeros((C_mid, S - W1), jnp.float32)
    y1_scr[:, :W1] = y1

    # ---- stage 2: Conv(1xK) along W, same contiguous-slice trick -------------
    # Columns at row-wrap positions are garbage and are dropped by the wrapper.
    C_out = o_ref.shape[0]
    acc2 = jnp.zeros((C_out, L_out), jnp.float32)
    for kw in range(K):
        ys = y1_scr[:, kw: kw + L_out]                        # (C_mid, L_out)
        w2k = w2_ref[:, kw * C_mid: (kw + 1) * C_mid]         # (C_out, C_mid)
        acc2 = acc2 + jnp.dot(w2k.astype(jnp.float32), ys,
                              preferred_element_type=jnp.float32)
    acc2 = acc2 + b2_ref[...]

    # Fused LeakyReLU epilogue; the (C_out, L_out) store is fully lane-dense.
    o_ref[...] = jnp.where(acc2 >= 0, acc2, NEG_SLOPE * acc2).astype(o_ref.dtype)


def facconv_forward(x_nchw, w1, b1, w2, b2, *, kernel_length, stride, padding):
    """FacConv forward. x: (N,C_in,H,W); w1: (C_mid,C_in,K,1); w2: (C_out,C_mid,1,K)."""
    N, C_in, H, W = x_nchw.shape
    C_mid = w1.shape[0]
    C_out = w2.shape[0]
    K = kernel_length
    p = padding

    # Dense (stride-1) geometry; striding is applied by subsampling at the end.
    Hp, Wp = H + 2 * p, W + 2 * p
    Ho = Hp - K + 1                 # dense conv1 output height
    Wo = Wp - K + 1                 # dense conv2 output width
    F_in = Hp * Wp
    W1 = Ho * Wp                    # stage-1 flat width (includes padded-W cols)
    L_out = _round_up(W1, 128)      # lane-dense output slab width
    S = L_out + K - 1               # scratch width so every conv2 tap fits

    # ---- glue (plain JAX, cheap): pad + flatten; pack per-tap weights --------
    xp = jnp.pad(x_nchw, ((0, 0), (0, 0), (p, p), (p, p)))
    x_flat = xp.reshape(N, C_in, F_in)

    w1p = jnp.transpose(w1[:, :, :, 0], (0, 2, 1)).reshape(C_mid, K * C_in)
    w2p = jnp.transpose(w2[:, :, 0, :], (0, 2, 1)).reshape(C_out, K * C_mid)
    b1c = b1.reshape(C_mid, 1).astype(jnp.float32)
    b2c = b2.reshape(C_out, 1).astype(jnp.float32)

    # Lane mask: 1 on real W columns, 0 on the W-padding columns.
    wcol = jnp.arange(Wp, dtype=jnp.int32)
    row_mask = ((wcol >= p) & (wcol < p + W)).astype(jnp.float32)
    mask = jnp.tile(row_mask, Ho).reshape(1, W1)

    kernel = partial(_facconv_kernel, K=K, C_in=C_in, C_mid=C_mid, Wp=Wp,
                     W1=W1, L_out=L_out)

    # Explicit VMEM budget (double-buffered x/out blocks + scratch + weights),
    # kept well under v7x's 64 MiB physical VMEM.
    bytes_per_step = 4 * (2 * C_in * F_in + 2 * C_out * L_out + C_mid * S
                          + C_mid * K * C_in + C_out * K * C_mid
                          + C_mid + C_out + W1)
    vmem_limit = int(min(64 * 2 ** 20, max(4 * 2 ** 20, 8 * bytes_per_step)))

    cost = pl.CostEstimate(
        flops=2 * N * K * (C_mid * C_in * W1 + C_out * C_mid * L_out),
        transcendentals=0,
        bytes_accessed=4 * (N * C_in * F_in + C_mid * K * C_in
                            + C_out * K * C_mid + C_mid + C_out + W1
                            + N * C_out * L_out))

    out_slab = pl.pallas_call(
        kernel,
        out_shape=jax.ShapeDtypeStruct((N, C_out, L_out), x_nchw.dtype),
        grid_spec=pltpu.PrefetchScalarGridSpec(
            num_scalar_prefetch=0,
            grid=(N,),
            in_specs=[
                pl.BlockSpec((None, C_in, F_in), lambda n: (n, 0, 0)),
                pl.BlockSpec((C_mid, K * C_in), lambda n: (0, 0)),
                pl.BlockSpec((C_out, K * C_mid), lambda n: (0, 0)),
                pl.BlockSpec((C_mid, 1), lambda n: (0, 0)),
                pl.BlockSpec((C_out, 1), lambda n: (0, 0)),
                pl.BlockSpec((1, W1), lambda n: (0, 0)),
            ],
            out_specs=pl.BlockSpec((None, C_out, L_out), lambda n: (n, 0, 0)),
            scratch_shapes=[pltpu.VMEM((C_mid, S), jnp.float32)],
        ),
        compiler_params=pltpu.CompilerParams(
            dimension_semantics=("parallel",),
            vmem_limit_bytes=vmem_limit),
        cost_estimate=cost,
    )(x_flat, w1p, w2p, b1c, b2c, mask)

    # Keep columns j = h*Wp + wo (wo < Wo); drop lane padding + row-wrap garbage.
    out_dense = out_slab[:, :, :W1].reshape(N, C_out, Ho, Wp)[:, :, :, :Wo]
    if stride > 1:
        # Striding the two 1-D convs == dense compute + subsample.
        out_dense = out_dense[:, :, ::stride, ::stride]
    return out_dense


def init_facconv_params(key, C_in, C_out, kernel_length):
    """PyTorch Conv2d-style init: U(-sqrt(k), sqrt(k)), k = 1/fan_in, per conv."""
    k1w, k1b, k2w, k2b = jax.random.split(key, 4)
    bound1 = 1.0 / math.sqrt(C_in * kernel_length * 1)
    w1 = jax.random.uniform(k1w, (C_in, C_in, kernel_length, 1),
                            minval=-bound1, maxval=bound1, dtype=jnp.float32)
    b1 = jax.random.uniform(k1b, (C_in,), minval=-bound1, maxval=bound1,
                            dtype=jnp.float32)
    bound2 = 1.0 / math.sqrt(C_in * 1 * kernel_length)
    w2 = jax.random.uniform(k2w, (C_out, C_in, 1, kernel_length),
                            minval=-bound2, maxval=bound2, dtype=jnp.float32)
    b2 = jax.random.uniform(k2b, (C_out,), minval=-bound2, maxval=bound2,
                            dtype=jnp.float32)
    return w1, b1, w2, b2


def _reference(x, w1, b1, w2, b2, *, stride, padding):
    y = jax.lax.conv_general_dilated(
        x, w1, window_strides=(stride, 1),
        padding=((padding, padding), (0, 0)),
        dimension_numbers=("NCHW", "OIHW", "NCHW"))
    y = y + b1.reshape(1, -1, 1, 1)
    z = jax.lax.conv_general_dilated(
        y, w2, window_strides=(1, stride),
        padding=((0, 0), (padding, padding)),
        dimension_numbers=("NCHW", "OIHW", "NCHW"))
    z = z + b2.reshape(1, -1, 1, 1)
    return jnp.where(z >= 0, z, NEG_SLOPE * z)


if __name__ == "__main__":
    # FacConv(C_in=4, C_out=8, kernel_length=3, stride=1, padding=1)
    C_in, C_out = 4, 8
    kernel_length, stride, padding = 3, 1, 1
    N, H, W = 2, 16, 16

    key = jax.random.PRNGKey(0)
    k_x, k_p = jax.random.split(key)
    x = jax.random.normal(k_x, (N, C_in, H, W), dtype=jnp.float32)
    w1, b1, w2, b2 = init_facconv_params(k_p, C_in, C_out, kernel_length)

    run = jax.jit(partial(facconv_forward, kernel_length=kernel_length,
                          stride=stride, padding=padding))
    out = jax.block_until_ready(run(x, w1, b1, w2, b2))
    ref = _reference(x, w1, b1, w2, b2, stride=stride, padding=padding)
    assert out.shape == ref.shape == (N, C_out, H, W), (out.shape, ref.shape)
    assert jnp.allclose(out, ref, atol=1e-5, rtol=1e-5)

    # stride-2 (reduction-cell) configuration: same kernel, wrapper subsamples.
    run2 = jax.jit(partial(facconv_forward, kernel_length=kernel_length,
                           stride=2, padding=padding))
    out2 = jax.block_until_ready(run2(x, w1, b1, w2, b2))
    ref2 = _reference(x, w1, b1, w2, b2, stride=2, padding=padding)
    assert out2.shape == ref2.shape, (out2.shape, ref2.shape)
    assert jnp.allclose(out2, ref2, atol=1e-5, rtol=1e-5)

    print("KERNEL_OK")
</pallas_src>

<mosaic_0001>
module attributes {stable_mosaic.version = 11 : i64} {
  func.func @_facconv_kernel(%arg0: i32, %arg1: memref<1x4x324xf32, #tpu.memory_space<vmem>>, %arg2: memref<4x12xf32, #tpu.memory_space<vmem>>, %arg3: memref<8x12xf32, #tpu.memory_space<vmem>>, %arg4: memref<4x1xf32, #tpu.memory_space<vmem>>, %arg5: memref<8x1xf32, #tpu.memory_space<vmem>>, %arg6: memref<1x288xf32, #tpu.memory_space<vmem>>, %arg7: memref<1x8x384xf32, #tpu.memory_space<vmem>>, %arg8: memref<4x386xf32, #tpu.memory_space<vmem>>) attributes {dimension_semantics = [#tpu.dimension_semantics<parallel>], iteration_bounds = array<i64: 2>, scalar_prefetch = 0 : i64, scratch_operands = 1 : i64, tpu.core_type = #tpu.core_type<tc>, window_params = [{transform_indices = @transform_0, window_bounds = array<i64: 1, 4, 324>}, {pipeline_mode = #tpu.pipeline_mode<synchronous>, transform_indices = @transform_1, window_bounds = array<i64: 4, 12>}, {pipeline_mode = #tpu.pipeline_mode<synchronous>, transform_indices = @transform_2, window_bounds = array<i64: 8, 12>}, {pipeline_mode = #tpu.pipeline_mode<synchronous>, transform_indices = @transform_3, window_bounds = array<i64: 4, 1>}, {pipeline_mode = #tpu.pipeline_mode<synchronous>, transform_indices = @transform_4, window_bounds = array<i64: 8, 1>}, {pipeline_mode = #tpu.pipeline_mode<synchronous>, transform_indices = @transform_5, window_bounds = array<i64: 1, 288>}, {transform_indices = @transform_6, window_bounds = array<i64: 1, 8, 384>}]} {
    %cst = arith.constant 0.000000e+00 : f32
    %0 = vector.broadcast %cst : f32 to vector<4x288xf32>
    %c0 = arith.constant 0 : index
    %c0_0 = arith.constant 0 : index
    %c0_1 = arith.constant 0 : index
    %1 = vector.load %arg1[%c0, %c0_0, %c0_1] : memref<1x4x324xf32, #tpu.memory_space<vmem>>, vector<1x4x288xf32>
    %2 = vector.shape_cast %1 : vector<1x4x288xf32> to vector<4x288xf32>
    %c0_2 = arith.constant 0 : index
    %c0_3 = arith.constant 0 : index
    %3 = vector.load %arg2[%c0_2, %c0_3] : memref<4x12xf32, #tpu.memory_space<vmem>>, vector<4x4xf32>
    %cst_4 = arith.constant dense<0.000000e+00> : vector<4x288xf32>
    %4 = tpu.matmul %3, %2, %cst_4 {dimension_numbers = #tpu.dot_dimension_numbers<[1], [0], [0], [1], [0, 0, 1, 1], [], []>} : vector<4x4xf32>, vector<4x288xf32>, vector<4x288xf32> -> vector<4x288xf32>
    %5 = arith.addf %0, %4 : vector<4x288xf32>
    %c0_5 = arith.constant 0 : index
    %c0_6 = arith.constant 0 : index
    %c18 = arith.constant 18 : index
    %6 = vector.load %arg1[%c0_5, %c0_6, %c18] : memref<1x4x324xf32, #tpu.memory_space<vmem>>, vector<1x4x288xf32>
    %7 = vector.shape_cast %6 : vector<1x4x288xf32> to vector<4x288xf32>
    %c0_7 = arith.constant 0 : index
    %c4 = arith.constant 4 : index
    %8 = vector.load %arg2[%c0_7, %c4] : memref<4x12xf32, #tpu.memory_space<vmem>>, vector<4x4xf32>
    %cst_8 = arith.constant dense<0.000000e+00> : vector<4x288xf32>
    %9 = tpu.matmul %8, %7, %cst_8 {dimension_numbers = #tpu.dot_dimension_numbers<[1], [0], [0], [1], [0, 0, 1, 1], [], []>} : vector<4x4xf32>, vector<4x288xf32>, vector<4x288xf32> -> vector<4x288xf32>
    %10 = arith.addf %5, %9 : vector<4x288xf32>
    %c0_9 = arith.constant 0 : index
    %c0_10 = arith.constant 0 : index
    %c36 = arith.constant 36 : index
    %11 = vector.load %arg1[%c0_9, %c0_10, %c36] : memref<1x4x324xf32, #tpu.memory_space<vmem>>, vector<1x4x288xf32>
    %12 = vector.shape_cast %11 : vector<1x4x288xf32> to vector<4x288xf32>
    %c0_11 = arith.constant 0 : index
    %c8 = arith.constant 8 : index
    %13 = vector.load %arg2[%c0_11, %c8] : memref<4x12xf32, #tpu.memory_space<vmem>>, vector<4x4xf32>
    %cst_12 = arith.constant dense<0.000000e+00> : vector<4x288xf32>
    %14 = tpu.matmul %13, %12, %cst_12 {dimension_numbers = #tpu.dot_dimension_numbers<[1], [0], [0], [1], [0, 0, 1, 1], [], []>} : vector<4x4xf32>, vector<4x288xf32>, vector<4x288xf32> -> vector<4x288xf32>
    %15 = arith.addf %10, %14 : vector<4x288xf32>
    %c0_13 = arith.constant 0 : index
    %c0_14 = arith.constant 0 : index
    %16 = vector.load %arg4[%c0_13, %c0_14] : memref<4x1xf32, #tpu.memory_space<vmem>>, vector<4x1xf32>
    %17 = vector.broadcast %16 : vector<4x1xf32> to vector<4x288xf32>
    %18 = arith.addf %15, %17 : vector<4x288xf32>
    %c0_15 = arith.constant 0 : index
    %c0_16 = arith.constant 0 : index
    %19 = vector.load %arg6[%c0_15, %c0_16] : memref<1x288xf32, #tpu.memory_space<vmem>>, vector<1x288xf32>
    %20 = vector.broadcast %19 : vector<1x288xf32> to vector<4x288xf32>
    %21 = arith.mulf %18, %20 : vector<4x288xf32>
    %cst_17 = arith.constant 0.000000e+00 : f32
    %22 = vector.broadcast %cst_17 : f32 to vector<4x98xf32>
    %c0_18 = arith.constant 0 : index
    %c288 = arith.constant 288 : index
    %23 = vector.load %arg8[%c0_18, %c288] : memref<4x386xf32, #tpu.memory_space<vmem>>, vector<4x98xf32>
    tpu.vector_store %arg8[%c0_18, %c288], %22 {strides = array<i32>} : memref<4x386xf32, #tpu.memory_space<vmem>>, vector<4x98xf32>,
    %c0_19 = arith.constant 0 : index
    %c0_20 = arith.constant 0 : index
    %24 = vector.load %arg8[%c0_19, %c0_20] : memref<4x386xf32, #tpu.memory_space<vmem>>, vector<4x288xf32>
    tpu.vector_store %arg8[%c0_19, %c0_20], %21 {strides = array<i32>} : memref<4x386xf32, #tpu.memory_space<vmem>>, vector<4x288xf32>,
    %cst_21 = arith.constant 0.000000e+00 : f32
    %25 = vector.broadcast %cst_21 : f32 to vector<8x384xf32>
    %c0_22 = arith.constant 0 : index
    %c0_23 = arith.constant 0 : index
    %26 = vector.load %arg8[%c0_22, %c0_23] : memref<4x386xf32, #tpu.memory_space<vmem>>, vector<4x384xf32>
    %c0_24 = arith.constant 0 : index
    %c0_25 = arith.constant 0 : index
    %27 = vector.load %arg3[%c0_24, %c0_25] : memref<8x12xf32, #tpu.memory_space<vmem>>, vector<8x4xf32>
    %cst_26 = arith.constant dense<0.000000e+00> : vector<8x384xf32>
    %28 = tpu.matmul %27, %26, %cst_26 {dimension_numbers = #tpu.dot_dimension_numbers<[1], [0], [0], [1], [0, 0, 1, 1], [], []>} : vector<8x4xf32>, vector<4x384xf32>, vector<8x384xf32> -> vector<8x384xf32>
    %29 = arith.addf %25, %28 : vector<8x384xf32>
    %c0_27 = arith.constant 0 : index
    %c1 = arith.constant 1 : index
    %30 = vector.load %arg8[%c0_27, %c1] : memref<4x386xf32, #tpu.memory_space<vmem>>, vector<4x384xf32>
    %c0_28 = arith.constant 0 : index
    %c4_29 = arith.constant 4 : index
    %31 = vector.load %arg3[%c0_28, %c4_29] : memref<8x12xf32, #tpu.memory_space<vmem>>, vector<8x4xf32>
    %cst_30 = arith.constant dense<0.000000e+00> : vector<8x384xf32>
    %32 = tpu.matmul %31, %30, %cst_30 {dimension_numbers = #tpu.dot_dimension_numbers<[1], [0], [0], [1], [0, 0, 1, 1], [], []>} : vector<8x4xf32>, vector<4x384xf32>, vector<8x384xf32> -> vector<8x384xf32>
    %33 = arith.addf %29, %32 : vector<8x384xf32>
    %c0_31 = arith.constant 0 : index
    %c2 = arith.constant 2 : index
    %34 = vector.load %arg8[%c0_31, %c2] : memref<4x386xf32, #tpu.memory_space<vmem>>, vector<4x384xf32>
    %c0_32 = arith.constant 0 : index
    %c8_33 = arith.constant 8 : index
    %35 = vector.load %arg3[%c0_32, %c8_33] : memref<8x12xf32, #tpu.memory_space<vmem>>, vector<8x4xf32>
    %cst_34 = arith.constant dense<0.000000e+00> : vector<8x384xf32>
    %36 = tpu.matmul %35, %34, %cst_34 {dimension_numbers = #tpu.dot_dimension_numbers<[1], [0], [0], [1], [0, 0, 1, 1], [], []>} : vector<8x4xf32>, vector<4x384xf32>, vector<8x384xf32> -> vector<8x384xf32>
    %37 = arith.addf %33, %36 : vector<8x384xf32>
    %c0_35 = arith.constant 0 : index
    %c0_36 = arith.constant 0 : index
    %38 = vector.load %arg5[%c0_35, %c0_36] : memref<8x1xf32, #tpu.memory_space<vmem>>, vector<8x1xf32>
    %39 = vector.broadcast %38 : vector<8x1xf32> to vector<8x384xf32>
    %40 = arith.addf %37, %39 : vector<8x384xf32>
    %cst_37 = arith.constant 0.000000e+00 : f32
    %41 = vector.broadcast %cst_37 : f32 to vector<8x384xf32>
    %42 = arith.cmpf oge, %40, %41 : vector<8x384xf32>
    %cst_38 = arith.constant 0.00999999977 : f32
    %43 = vector.broadcast %cst_38 : f32 to vector<8x384xf32>
    %44 = arith.mulf %43, %40 : vector<8x384xf32>
    %45 = arith.select %42, %40, %44 : vector<8x384xi1>, vector<8x384xf32>
    %c0_39 = arith.constant 0 : index
    %c0_40 = arith.constant 0 : index
    %c0_41 = arith.constant 0 : index
    %46 = vector.load %arg7[%c0_39, %c0_40, %c0_41] : memref<1x8x384xf32, #tpu.memory_space<vmem>>, vector<1x8x384xf32>
    %47 = vector.shape_cast %46 : vector<1x8x384xf32> to vector<8x384xf32>
    %48 = vector.shape_cast %45 : vector<8x384xf32> to vector<1x8x384xf32>
    tpu.vector_store %arg7[%c0_39, %c0_40, %c0_41], %48 {strides = array<i32>} : memref<1x8x384xf32, #tpu.memory_space<vmem>>, vector<1x8x384xf32>,
    return
  }
  func.func @transform_0(%arg0: i32) -> (i32, i32, i32) {
    %c0_i32 = arith.constant 0 : i32
    %c0_i32_0 = arith.constant 0 : i32
    %c0_i32_1 = arith.constant 0 : i32
    return %arg0, %c0_i32, %c0_i32_0 : i32, i32, i32
  }
  func.func @transform_1(%arg0: i32) -> (i32, i32) {
    %c0_i32 = arith.constant 0 : i32
    %c0_i32_0 = arith.constant 0 : i32
    %c0_i32_1 = arith.constant 0 : i32
    return %c0_i32, %c0_i32_0 : i32, i32
  }
  func.func @transform_2(%arg0: i32) -> (i32, i32) {
    %c0_i32 = arith.constant 0 : i32
    %c0_i32_0 = arith.constant 0 : i32
    %c0_i32_1 = arith.constant 0 : i32
    return %c0_i32, %c0_i32_0 : i32, i32
  }
  func.func @transform_3(%arg0: i32) -> (i32, i32) {
    %c0_i32 = arith.constant 0 : i32
    %c0_i32_0 = arith.constant 0 : i32
    %c0_i32_1 = arith.constant 0 : i32
    return %c0_i32, %c0_i32_0 : i32, i32
  }
  func.func @transform_4(%arg0: i32) -> (i32, i32) {
    %c0_i32 = arith.constant 0 : i32
    %c0_i32_0 = arith.constant 0 : i32
    %c0_i32_1 = arith.constant 0 : i32
    return %c0_i32, %c0_i32_0 : i32, i32
  }
  func.func @transform_5(%arg0: i32) -> (i32, i32) {
    %c0_i32 = arith.constant 0 : i32
    %c0_i32_0 = arith.constant 0 : i32
    %c0_i32_1 = arith.constant 0 : i32
    return %c0_i32, %c0_i32_0 : i32, i32
  }
  func.func @transform_6(%arg0: i32) -> (i32, i32, i32) {
    %c0_i32 = arith.constant 0 : i32
    %c0_i32_0 = arith.constant 0 : i32
    %c0_i32_1 = arith.constant 0 : i32
    return %arg0, %c0_i32, %c0_i32_0 : i32, i32, i32
  }
}

</mosaic_0001>

<bundles_post_ra>
// kernel: tile.8
= control target key start
LH: loop header
LB: loop body
LE: loop exit
PB: predicated region body
PF: predicated region fallthrough
CT: control target
= control target key end

     0   :  { %s28_s0 = inlined_call_operand.vmem [shape: f32[18], index: 0, kind: input, shape index: {}]   ;;  %s29_s1 = inlined_call_operand.vmem [shape: f32[16,18], index: 1, kind: output, shape index: {}]  }
   0x1   :  { %v4_v0 = vld [vmem:[%s28_s0] ss:$0 sm:$0xff] }
   0x2   :  { %5 = vst [vmem:[%s29_s1] sm:$0xff] %v4_v0  ;;  %8 = vst [vmem:[%s29_s1 + $0x8] sm:$0xff] %v4_v0 }

// kernel: tile.9
= control target key start
LH: loop header
LB: loop body
LE: loop exit
PB: predicated region body
PF: predicated region fallthrough
CT: control target
= control target key end

     0   :  { %vm9_vm0 = vcmask 15360   ;;  %vm22_vm1 = vcmask 31744   ;;  %s169_s14 = smov 126   ;;  %s170_s15 = smov 108   ;;  %vm3_vm2 = vcmask 146432   ;;  %vm13_vm3 = vcmask 130048   ;;  %s257_s0 = inlined_call_operand.vmem [shape: f32[16,18], index: 0, kind: input, shape index: {}]   ;;  %s258_s1 = inlined_call_operand.vmem [shape: f32[1,288], index: 1, kind: output, shape index: {}]  }
   0x1   :  { %v135_v0 = vld [vmem:[%s257_s0 + $0x7] sm:$0x1]   ;;  %v139_v3 = vld [vmem:[%s257_s0 + $0x6] sm:$0x1]   ;;  %v137_v4 = vld [vmem:[%s257_s0 + $0xe] sm:$0x1]  }
   0x2   :  { %v136_v1 = vld [vmem:[%s257_s0 + $0x7] sm:$0x1]   ;;  %34 = vrot.lane.b32.xlu1 %v139_v3, %s170_s15  ;;  %v138_v5 = vld [vmem:[%s257_s0 + $0xe] sm:$0x1]   ;;  %v140_v7 = vld [vmem:[%s257_s0 + $0xd] sm:$0x1]  }
   0x3   :  { %v10_v2 = vsel %vm9_vm0, %v136_v1, %v135_v0  ;;  %v23_v6 = vsel %vm22_vm1, %v138_v5, %v137_v4  ;;  %s171_s20 = smov 124   ;;  %s172_s21 = smov 106   ;;  %v141_v8 = vld [vmem:[%s257_s0 + $0x5] sm:$0x1]   ;;  %v142_v9 = vld [vmem:[%s257_s0 + $0xc] sm:$0x1]  }
   0x4   :  { %11 = vrot.lane.b32.xlu0 %v10_v2, %s169_s14  ;;  %v2_v10 = vld [vmem:[%s257_s0] sm:$0x1]   ;;  %s173_s28 = smov 90   ;;  %s174_s29 = smov 88   ;;  %v143_v11 = vld [vmem:[%s257_s0 + $0x4] sm:$0x1]  }
   0x5   :  { %4 = vst.msk [vmem:[#allocation0] sm:$0x1] %vm3_vm2, %v2_v10   ;;  %v144_v12 = vld [vmem:[%s257_s0 + $0xb] sm:$0x1]   ;;  %s175_s5 = smov 72   ;;  %s176_s6 = smov 70  }
   0x6   :  { %40 = vrot.lane.b32.xlu1 %v140_v7, %s172_s21  ;;  %v145_v13 = vld [vmem:[%s257_s0 + $0x3] sm:$0x1]   ;;  %v146_v14 = vld [vmem:[%s257_s0 + $0xa] sm:$0x1]   ;;  %s177_s11 = smov 54   ;;  %s178_s12 = smov 52  }
   0x7   :  { %v147_v15 = vld [vmem:[%s257_s0 + $0x2] sm:$0x1]   ;;  %v148_v16 = vld [vmem:[%s257_s0 + $0x9] sm:$0x1]   ;;  %s179_s17 = smov 36   ;;  %s180_s18 = smov 34  }
   0x8   :  { %24 = vrot.lane.b32.xlu0 %v23_v6, %s171_s20  ;;  %v149_v17 = vld [vmem:[%s257_s0 + $0x1] sm:$0x1]   ;;  %v150_v18 = vld [vmem:[%s257_s0 + $0x8] sm:$0x1]   ;;  %s181_s23 = smov 18   ;;  %s182_s24 = smov 16  }
   0x9   :  { %v151_v19 = vld [vmem:[%s257_s0 + $0xf] sm:$0x1]   ;;  %s183_s0 = smov 14   ;;  %vm16_vm4 = vcmask 1048560   ;;  %vm36_vm5 = vcmask 1032032   ;;  %vm26_vm6 = vcmask 113664  }
   0xa   :  { %53 = vrot.lane.b32.xlu1 %v142_v9, %s174_s29  ;;  %vm29_vm7 = vcmask 1048544   ;;  %vm42_vm8 = vcmask 1015632   ;;  %vm49_vm9 = vcmask 884432   ;;  %vm55_vm10 = vcmask 868032  }
   0xb   :  { %vm62_vm11 = vcmask 736832   ;;  %vm68_vm12 = vcmask 720432   ;;  %vm75_vm13 = vcmask 589232   ;;  %vm81_vm14 = vcmask 572832  }
   0xc   :  { %47 = vrot.lane.b32.xlu0 %v141_v8, %s173_s28  ;;  %vm88_vm15 = vcmask 441632   ;;  %vm94_vm0 = vcmask 425232   ;;  %vm101_vm1 = vcmask 294032   ;;  %vm107_vm2 = vcmask 277632  }
   0xe   :  { %66 = vrot.lane.b32.xlu1 %v144_v12, %s176_s6 }
  0x10   :  { %60 = vrot.lane.b32.xlu0 %v143_v11, %s175_s5 }
  0x12   :  { %79 = vrot.lane.b32.xlu1 %v146_v14, %s178_s12 }
  0x14   :  { %73 = vrot.lane.b32.xlu0 %v145_v13, %s177_s11 }
  0x16   :  { %92 = vrot.lane.b32.xlu1 %v148_v16, %s180_s18 }
  0x18   :  { %86 = vrot.lane.b32.xlu0 %v147_v15, %s179_s17 }
  0x1a   :  { %105 = vrot.lane.b32.xlu1 %v150_v18, %s182_s24 }
  0x1c   :  { %99 = vrot.lane.b32.xlu0 %v149_v17, %s181_s23 }
  0x20   :  { %112 = vrot.lane.b32.xlu0 %v151_v19, %s183_s0 }
  0x74   :  { %v35_v21 = vpop.permute.xlu1 %34  }
  0x76   :  { %v12_v20 = vpop.permute.xlu0 %11  }
  0x77   :  { %15 = vst.msk [vmem:[#allocation0 + $0x8] sm:$0x1] %vm13_vm3, %v12_v20   ;;  %vm114_vm3 = vcmask 261232  }
  0x78   :  { %17 = vst.msk [vmem:[#allocation0] sm:$0x1] %vm16_vm4, %v12_v20   ;;  %v41_v23 = vpop.permute.xlu1 %40  }
  0x79   :  { %37 = vst.msk [vmem:[#allocation0] sm:$0x1] %vm36_vm5, %v35_v21  }
  0x7a   :  { %v25_v22 = vpop.permute.xlu0 %24  }
  0x7b   :  { %28 = vst.msk [vmem:[#allocation0 + $0x10] sm:$0x1] %vm26_vm6, %v25_v22  }
  0x7c   :  { %31 = vst.msk [vmem:[#allocation0 + $0x8] sm:$0x1] %vm29_vm7, %v25_v22   ;;  %v54_v25 = vpop.permute.xlu1 %53  }
  0x7d   :  { %44 = vst.msk [vmem:[#allocation0 + $0x8] sm:$0x1] %vm42_vm8, %v41_v23  }
  0x7e   :  { %v48_v24 = vpop.permute.xlu0 %47   ;;  %57 = vst.msk [vmem:[#allocation0 + $0x8] sm:$0x1] %vm55_vm10, %v54_v25  }
  0x7f   :  { %50 = vst.msk [vmem:[#allocation0] sm:$0x1] %vm49_vm9, %v48_v24  }
  0x80   :  { %v67_v27 = vpop.permute.xlu1 %66  }
  0x81   :  { %70 = vst.msk [vmem:[#allocation0 + $0x8] sm:$0x1] %vm68_vm12, %v67_v27  }
  0x82   :  { %v61_v26 = vpop.permute.xlu0 %60  }
  0x83   :  { %63 = vst.msk [vmem:[#allocation0] sm:$0x1] %vm62_vm11, %v61_v26  }
  0x84   :  { %v80_v29 = vpop.permute.xlu1 %79  }
  0x85   :  { %83 = vst.msk [vmem:[#allocation0 + $0x8] sm:$0x1] %vm81_vm14, %v80_v29  }
  0x86   :  { %v74_v28 = vpop.permute.xlu0 %73  }
  0x87   :  { %76 = vst.msk [vmem:[#allocation0] sm:$0x1] %vm75_vm13, %v74_v28  }
  0x88   :  { %v93_v31 = vpop.permute.xlu1 %92  }
  0x89   :  { %96 = vst.msk [vmem:[#allocation0 + $0x8] sm:$0x1] %vm94_vm0, %v93_v31  }
  0x8a   :  { %v87_v30 = vpop.permute.xlu0 %86  }
  0x8b   :  { %89 = vst.msk [vmem:[#allocation0] sm:$0x1] %vm88_vm15, %v87_v30  }
  0x8c   :  { %v106_v33 = vpop.permute.xlu1 %105  }
  0x8d   :  { %109 = vst.msk [vmem:[#allocation0 + $0x8] sm:$0x1] %vm107_vm2, %v106_v33  }
  0x8e   :  { %v100_v32 = vpop.permute.xlu0 %99  }
  0x8f   :  { %102 = vst.msk [vmem:[#allocation0] sm:$0x1] %vm101_vm1, %v100_v32  }
  0x92   :  { %v113_v34 = vpop.permute.xlu0 %112  }
  0x93   :  { %116 = vst.msk [vmem:[#allocation0 + $0x10] sm:$0x1] %vm114_vm3, %v113_v34  }
  0x94   :  { %v124_v36 = vld [vmem:[#allocation0 + $0x8] sm:$0x1] }
  0x95   :  { %152 = vst [vmem:[%s258_s1 + $0x1] sm:$0x1] %v124_v36 }
  0x96   :  { %v120_v35 = vld [vmem:[#allocation0] sm:$0x1] }
  0x97   :  { %122 = vst [vmem:[%s258_s1] sm:$0x1] %v120_v35 }
  0x9a   :  { %v129_v37 = vld [vmem:[#allocation0 + $0x10] sm:$0x1] }
  0x9b   :  { %153 = vst [vmem:[%s258_s1 + $0x2] sm:$0x1] %v129_v37 }

// kernel: facconv_forward.1
= control target key start
LH: loop header
LB: loop body
LE: loop exit
PB: predicated region body
PF: predicated region fallthrough
CT: control target
= control target key end

     0   :  { %s1516_s21 = smov 0   ;;  %s1616_s0 = inlined_call_operand.vmem [shape: f32[2,4,324], index: 0, kind: input, shape index: {}]   ;;  %s1617_s1 = inlined_call_operand.vmem [shape: f32[4,12], index: 1, kind: input, shape index: {}]   ;;  %s1618_s2 = inlined_call_operand.vmem [shape: f32[8,12], index: 2, kind: input, shape index: {}]   ;;  %s1619_s3 = inlined_call_operand.vmem [shape: f32[4,1], index: 3, kind: input, shape index: {}]   ;;  %s1620_s4 = inlined_call_operand.vmem [shape: f32[8,1], index: 4, kind: input, shape index: {}]   ;;  %s1621_s5 = inlined_call_operand.vmem [shape: f32[1,288], index: 5, kind: input, shape index: {}]   ;;  %s1622_s6 = inlined_call_operand.vmem [shape: f32[2,8,384], index: 6, kind: output, shape index: {}]  }
   0x1 LB: > { %s1352_s22 = sadd.s32 4294967295, %s1470_s21   ;;  %p1356_p0 = scmp.ge.s32.totalorder %s1470_s21, 1  ;;  %s1470_s21 = sphi %s1516_s21, %s16_s21  }
   0x2   : > { %p212_p1 = scmp.lt.s32.totalorder %s1470_s21, 3 }
   0x4   : > { %p213_p2 = pnand %p1356_p0, %p212_p1 }
   0x5   : > { %p242_p3 = scmp.lt.s32.totalorder (!%p213_p2), %s1352_s22, 1  ;;  %v1472_v0 = vmov (!%p213_p2), 0.0   ;;  %vm1473_vm0 = vmmov (!%p213_p2), 0   ;;  %s1474_s27 = smov (!%p213_p2), 110   ;;  %v254_v3 = vld [vmem:[%s1617_s1] sm:$0xf] (!%p213_p2)  ;;  %v751_v21 = vlaneseq (!%p213_p2) }
   0x6   : > { %216 = sbr.rel (%p213_p2) target bundleno = 732 (0x2dc), region = 44  ;;  %1403 = vmatprep.subr.mxu1 (!%p213_p2), %v1472_v0  ;;  %1405 = vmatprep.mubr.msk.f32.mxu1 (!%p213_p2), %vm1473_vm0, %v1472_v0  ;;  %s1475_s30 = smov (!%p213_p2), 124   ;;  %v572_v6 = vld [vmem:[%s1617_s1] sm:$0xf] (!%p213_p2)  ;;  %v1478_v7 = vmov (!%p213_p2), 0   ;;  %vm273_vm1 = vcmask (!%p213_p2), 1043456  }
   0x7   : > { %344 = vmatprep.mubr.f32.mxu0 (!%p213_p2), %v1472_v0  ;;  %s1476_s7 = smov (!%p213_p2), 92   ;;  %s1477_s10 = smov (!%p213_p2), 120   ;;  %1460 = vset.pattern.permute.xlu0 (!%p213_p2), %v1478_v7  ;;  %v740_v8 = vld [vmem:[%s1619_s3] sm:$0xf] (!%p213_p2)  ;;  %vm267_vm2 = vcmask (!%p213_p2), 900096   ;;  %vm270_vm3 = vcmask (!%p213_p2), 31744  }
   0x8   : > { %vm585_vm4 = vcmask (!%p213_p2), 752640   ;;  %vm769_vm5 = vcmask (!%p213_p2), 1043712   ;;  %vm770_vm6 = vcmask (!%p213_p2), 15364   ;;  %v752_v24 = vshrl.u32 (!%p213_p2), %v751_v21, 7  ;;  %v749_v29 = vld [vmem:[%s1621_s5] sm:$0x7] (!%p213_p2) }
   0x9   : > { %vm771_vm7 = vmor (!%p213_p2), %vm770_vm6, %vm769_vm5  ;;  %vm778_vm8 = vcmask (!%p213_p2), 257024   ;;  %s1479_s15 = smov (!%p213_p2), 127   ;;  %v782_v51 = vld [vmem:[%s1618_s2] sm:$0xff] (!%p213_p2)  ;;  %s1480_s18 = smov (!%p213_p2), 126   ;;  %vm799_vm9 = vcmask (!%p213_p2), 1039360   ;;  %vm1120_vm10 = vcmask (!%p213_p2), 1031168  }
   0xa   : > { %772 = vst.msk [vmem:[#allocation2 + $0x8] sm:$0xff] (!%p213_p2), %vm771_vm7, %v1472_v0  ;;  %v761_v28 = vsub.s32 (!%p213_p2), 2, %v752_v24  ;;  %v753_v37 = vsub.s32 (!%p213_p2), 0, %v752_v24  ;;  %v757_v38 = vsub.s32 (!%p213_p2), 1, %v752_v24  ;;  %v1276_v52 = vld [vmem:[%s1620_s4] sm:$0xff] (!%p213_p2) }
   0xc   : > { %v762_v33 = vrot.slane (!%p213_p2), %v749_v29, %v761_v28  ;;  %v754_v39 = vrot.slane (!%p213_p2), %v749_v29, %v753_v37  ;;  %v758_v41 = vrot.slane (!%p213_p2), %v749_v29, %v757_v38 }
   0xd   : > { %s1624_s22 = smov (!%p242_p3, %s1352_s22), 1 }
   0xe   : > { %s1441_s23 = smul.u32 12, %s1624_s22 }
  0x10   : > { %s246_s26 = scalar_lea.vmem %s1616_s0, %s1441_s23  ;;  %s1442_s23 = smul.u32 24, %s1624_s22 }
  0x11   : > { %v252_v1 = vld [vmem:[%s246_s26] sm:$0xff]  ;;  %v253_v4 = vld [vmem:[%s246_s26 + $0x8] sm:$0xf] }
  0x12   : > { %261 = vrot.lane.b32.xlu1 %v252_v1, %s1474_s27  ;;  %v260_v2 = vcombine.high %v252_v1, %v252_v1  ;;  %v571_v5 = vld [vmem:[%s246_s26 + $0x8] sm:$0xf]  ;;  %s251_s26 = scalar_lea.vmem %s1622_s6, %s1442_s23 }
  0x14   : > { %263 = vrot.lane.b32.xlu0 %v260_v2, %s1474_s27 }
  0x16   : > { %256 = vrot.lane.b32.xlu1 %v254_v3, %s1475_s30 }
  0x18   : > { %265 = vrot.lane.b32.xlu0 %v253_v4, %s1474_s27 }
  0x1a   : > { %583 = vrot.lane.b32.xlu1 %v571_v5, %s1476_s7 }
  0x1c   : > { %581 = vrot.lane.b32.xlu0 %v260_v2, %s1476_s7 }
  0x1e   : > { %574 = vrot.lane.b32.xlu1 %v572_v6, %s1477_s10 }
  0x20   : > { %579 = vrot.lane.b32.xlu0 %v252_v1, %s1476_s7 }
  0x24   : > { %743 = vperm.xlu0 %1460, %v740_v8  }
  0x84   : > { %v262_v9 = vpop.permute.xlu1 %261 }
  0x86   : > { %v264_v10 = vpop.permute.xlu0 %263 }
  0x87   : > { %v268_v14 = vsel %vm267_vm2, %v262_v9, %v264_v10 }
  0x88   : > { %v257_v11 = vpop.permute.xlu1 %256 }
  0x8a   : > { %v266_v12 = vpop.permute.xlu0 %265 }
  0x8b   : > { %1404 = vmatpush3.msk.msra.mxu1 %vm273_vm1, %v266_v12  ;;  %v269_v13 = vsel %vm267_vm2, %v264_v10, %v266_v12 }
  0x8c   : > { %1359 = vmatprep.subr.msk.mxu0 %vm273_vm1, %v269_v13  ;;  %1406 = vmatmul.mubr.msk.f32.vlgmr.msra.gmra.mrb[0].mxu1 %vm270_vm3, %v257_v11  ;;  %v584_v15 = vpop.permute.xlu1 %583 }
  0x8d   : > { %1360 = vmatpush1.msk.msra.mxu0 %vm273_vm1, %v268_v14  ;;  %1408 = vmatprep.subr.mxu1 %v1472_v0 }
  0x8e   : > { %1361 = vmatmul.mubr.msk.f32.vlgmr.msra.gmra.mrb[0].mxu0 %vm270_vm3, %v257_v11  ;;  %v582_v16 = vpop.permute.xlu0 %581  ;;  %1364 = vmatprep.subr.msk.mxu0 %vm273_vm1, %v260_v2 }
  0x8f   : > { %v587_v17 = vsel %vm585_vm4, %v582_v16, %v584_v15  ;;  %1409 = vmatpush3.msk.msra.mxu1 %vm273_vm1, %v253_v4  ;;  %1410 = vmatprep.mubr.msk.f32.mxu1 %vm1473_vm0, %v1472_v0 }
  0x90   : > { %1365 = vmatpush1.msk.msra.mxu0 %vm273_vm1, %v252_v1  ;;  %1411 = vmatmul.mubr.msk.f32.vlgmr.msra.gmra.mrb[2].mxu1 %vm270_vm3, %v254_v3  ;;  %v575_v18 = vpop.permute.xlu1 %574 }
  0x91   : > { %1413 = vmatprep.subr.mxu1 %v1472_v0  ;;  %1415 = vmatprep.mubr.msk.f32.mxu1 %vm1473_vm0, %v1472_v0 }
  0x92   : > { %v580_v19 = vpop.permute.xlu0 %579  ;;  %1414 = vmatpush3.msk.msra.mxu1 %vm273_vm1, %v584_v15  ;;  %1369 = vmatprep.subr.msk.mxu0 %vm273_vm1, %v587_v17 }
  0x93   : > { %493 = vmatprep.mubr.f32.mxu0 %v1472_v0  ;;  %1418 = vmatprep.subr.mxu1 %v1472_v0  ;;  %v586_v20 = vsel %vm585_vm4, %v580_v19, %v582_v16 }
  0x94   : > { %1416 = vmatmul.mubr.msk.f32.vlgmr.msra.gmra.mrb[4].mxu1 %vm270_vm3, %v575_v18 }
  0x95   : > { %1420 = vmatprep.mubr.msk.f32.mxu1 %vm1473_vm0, %v1472_v0 }
  0x96   : > { %1366 = vmatmul.mubr.msk.f32.vlgmr.msra.gmra.mrb[0].mxu0 %vm270_vm3, %v254_v3 }
  0x97   : > { %1370 = vmatpush1.msk.msra.mxu0 %vm273_vm1, %v586_v20  ;;  %660 = vmatprep.mubr.f32.mxu0 %v1472_v0 }
  0x9e   : > { %1371 = vmatmul.mubr.msk.f32.vlgmr.msra.gmra.mrb[0].mxu0 %vm270_vm3, %v575_v18 }
  0x9f   : > { %875 = vmatprep.mubr.f32.mxu0 %v1472_v0 }
  0xa3   : > { %v744_v31 = vpop.permute.xlu0 %743 }
 0x15f   : > { %v417_v22 = vpop.f32.mrb[0].mxu1 }
 0x160   : > { %v1407_v23 = vpop.f32.mrb[1].mxu1 }
 0x163   : > { %v566_v25 = vpop.f32.mrb[2].mxu1 }
 0x164   : > { %v567_v26 = vadd.f32 %v566_v25, %v417_v22  ;;  %v1412_v27 = vpop.f32.mrb[3].mxu1 }
 0x167   : > { %v733_v30 = vpop.f32.mrb[4].mxu1 }
 0x168   : > { %v739_v32 = vadd.f32 %v733_v30, %v567_v26  ;;  %v1417_v34 = vpop.f32.mrb[5].mxu1 }
 0x16a   : > { %v748_v35 = vadd.f32 %v744_v31, %v739_v32 }
 0x16c   : > { %v768_v36 = vmul.f32 %v762_v33, %v748_v35 }
 0x16e   : > { %779 = vst.msk [vmem:[#allocation2 + $0x8] sm:$0xf] %vm778_vm8, %v768_v36 }
 0x171   : > { %v662_v40 = vpop.f32.mrb[0].mxu0 }
 0x172   : > { %v746_v42 = vadd.f32 %v744_v31, %v662_v40  ;;  %v664_v43 = vpop.f32.mrb[1].mxu0 }
 0x173   : > { %v747_v44 = vadd.f32 %v744_v31, %v664_v43 }
 0x174   : > { %v766_v45 = vmul.f32 %v754_v39, %v746_v42 }
 0x175   : > { %v767_v46 = vmul.f32 %v758_v41, %v747_v44  ;;  %v783_v47 = vld [vmem:[#allocation2 + $0x8] sm:$0xff] }
 0x176   : > { %795 = vrot.lane.b32.xlu1 %v783_v47, %s1479_s15  ;;  %v790_v50 = vcombine.high %v783_v47, %v783_v47  ;;  %v781_v62 = vld [vmem:[#allocation2 + $0x8] sm:$0xf] }
 0x177   : > { %v775_v48 = vcombine.low %v766_v45, %v767_v46  ;;  %v1463_v49 = vcombine.low %v767_v46, %v767_v46 }
 0x179   : > { %791 = vrot.lane.b32.xlu0 %v775_v48, %s1479_s15 }
 0x17a   : > { %793 = vrot.lane.b32.xlu1 %v1463_v49, %s1479_s15 }
 0x17d   : > { %797 = vrot.lane.b32.xlu0 %v790_v50, %s1479_s15 }
 0x17e   : > { %785 = vrot.lane.b32.xlu1 %v782_v51, %s1475_s30 }
 0x181   : > { %1116 = vrot.lane.b32.xlu0 %v783_v47, %s1480_s18 }
 0x182   : > { %1118 = vrot.lane.b32.xlu1 %v790_v50, %s1480_s18 }
 0x185   : > { %1112 = vrot.lane.b32.xlu0 %v775_v48, %s1480_s18 }
 0x186   : > { %1114 = vrot.lane.b32.xlu1 %v1463_v49, %s1480_s18 }
 0x189   : > { %1279 = vperm.xlu0 %1460, %v1276_v52  }
 0x18a   : > { %1106 = vrot.lane.b32.xlu1 %v782_v51, %s1477_s10 }
 0x1e8   : > { %v796_v53 = vpop.permute.xlu1 %795 }
 0x1eb   : > { %v792_v54 = vpop.permute.xlu0 %791 }
 0x1ec   : > { %v794_v55 = vpop.permute.xlu1 %793 }
 0x1ed   : > { %v800_v56 = vsel %vm799_vm9, %v792_v54, %v794_v55  ;;  %v801_v57 = vsel %vm799_vm9, %v794_v55, %v796_v53 }
 0x1ee   : > { %1374 = vmatprep.subr.msk.mxu0 %vm273_vm1, %v801_v57 }
 0x1ef   : > { %v798_v58 = vpop.permute.xlu0 %797  ;;  %1375 = vmatpush1.msk.msra.mxu0 %vm273_vm1, %v800_v56 }
 0x1f0   : > { %v802_v59 = vsel %vm799_vm9, %v796_v53, %v798_v58  ;;  %1379 = vmatprep.subr.msk.mxu0 %vm273_vm1, %v1463_v49  ;;  %v786_v60 = vpop.permute.xlu1 %785 }
 0x1f1   : > { %1419 = vmatpush3.msk.msra.mxu1 %vm273_vm1, %v802_v59  ;;  %1376 = vmatmul.mubr.msk.f32.vlgmr.msra.gmra.mrb[2].mxu0 %vm270_vm3, %v786_v60 }
 0x1f2   : > { %1421 = vmatmul.mubr.msk.f32.vlgmr.msra.gmra.mrb[6].mxu1 %vm270_vm3, %v786_v60  ;;  %1380 = vmatpush1.msk.msra.mxu0 %vm273_vm1, %v775_v48 }
 0x1f3   : > { %1423 = vmatprep.subr.mxu1 %v1472_v0  ;;  %v1117_v61 = vpop.permute.xlu0 %1116  ;;  %1425 = vmatprep.mubr.msk.f32.mxu1 %vm1473_vm0, %v1472_v0 }
 0x1f4   : > { %1424 = vmatpush3.msk.msra.mxu1 %vm273_vm1, %v781_v62  ;;  %v1119_v63 = vpop.permute.xlu1 %1118  ;;  %1025 = vmatprep.mubr.f32.mxu0 %v1472_v0 }
 0x1f5   : > { %1428 = vmatprep.subr.mxu1 %v1472_v0  ;;  %v1123_v1 = vsel %vm1120_vm10, %v1117_v61, %v1119_v63 }
 0x1f6   : > { %1426 = vmatmul.mubr.msk.f32.vlgmr.msra.gmra.mrb[8].mxu1 %vm270_vm3, %v782_v51 }
 0x1f7   : > { %1429 = vmatpush3.msk.msra.mxu1 %vm273_vm1, %v1123_v1  ;;  %1430 = vmatprep.mubr.msk.f32.mxu1 %vm1473_vm0, %v1472_v0  ;;  %v1113_v2 = vpop.permute.xlu0 %1112 }
 0x1f8   : > { %v1115_v3 = vpop.permute.xlu1 %1114 }
 0x1f9   : > { %v1121_v4 = vsel %vm1120_vm10, %v1113_v2, %v1115_v3  ;;  %v1122_v5 = vsel %vm1120_vm10, %v1115_v3, %v1117_v61  ;;  %1381 = vmatmul.mubr.msk.f32.vlgmr.msra.gmra.mrb[2].mxu0 %vm270_vm3, %v782_v51 }
 0x1fa   : > { %1384 = vmatprep.subr.msk.mxu0 %vm273_vm1, %v1122_v5  ;;  %1196 = vmatprep.mubr.f32.mxu0 %v1472_v0 }
 0x1fb   : > { %1385 = vmatpush1.msk.msra.mxu0 %vm273_vm1, %v1121_v4 }
 0x1fc   : > { %v1107_v6 = vpop.permute.xlu1 %1106 }
 0x1fd   : > { %1431 = vmatmul.mubr.msk.f32.vlgmr.msra.gmra.mrb[10].mxu1 %vm270_vm3, %v1107_v6 }
 0x201   : > { %1386 = vmatmul.mubr.msk.f32.vlgmr.msra.gmra.mrb[2].mxu0 %vm270_vm3, %v1107_v6 }
 0x208   : > { %v1280_v15 = vpop.permute.xlu0 %1279 }
 0x2c5   : > { %v948_v7 = vpop.f32.mrb[6].mxu1 }
 0x2c6   : > { %v1422_v8 = vpop.f32.mrb[7].mxu1 }
 0x2c9   : > { %v1098_v9 = vpop.f32.mrb[8].mxu1 }
 0x2ca   : > { %v1099_v10 = vadd.f32 %v1098_v9, %v948_v7  ;;  %v1427_v11 = vpop.f32.mrb[9].mxu1 }
 0x2d0   : > { %v1269_v12 = vpop.f32.mrb[10].mxu1 }
 0x2d1   : > { %v1275_v13 = vadd.f32 %v1269_v12, %v1099_v10  ;;  %v1432_v14 = vpop.f32.mrb[11].mxu1 }
 0x2d3   : > { %v1284_v16 = vadd.f32 %v1280_v15, %v1275_v13 }
 0x2d4   : > { %v1198_v17 = vpop.f32.mrb[2].mxu0 }
 0x2d5   : > { %vm1287_vm11 = vcmp.ge.f32.partialorder %v1284_v16, 0.0  ;;  %v1290_v0 = vmul.f32 0.01, %v1284_v16  ;;  %v1282_v18 = vadd.f32 %v1280_v15, %v1198_v17  ;;  %v1200_v19 = vpop.f32.mrb[3].mxu0 }
 0x2d6   : > { %v1283_v20 = vadd.f32 %v1280_v15, %v1200_v19 }
 0x2d7   : > { %v1293_v21 = vsel %vm1287_vm11, %v1284_v16, %v1290_v0  ;;  %vm1285_vm12 = vcmp.ge.f32.partialorder %v1282_v18, 0.0  ;;  %v1288_v22 = vmul.f32 0.01, %v1282_v18 }
 0x2d8   : > { %1296 = vst [vmem:[%s251_s26 + $0x10] sm:$0xff] %v1293_v21  ;;  %vm1286_vm13 = vcmp.ge.f32.partialorder %v1283_v20, 0.0  ;;  %v1289_v23 = vmul.f32 0.01, %v1283_v20 }
 0x2d9   : > { %v1291_v24 = vsel %vm1285_vm12, %v1282_v18, %v1288_v22 }
 0x2da   : > { %1294 = vst [vmem:[%s251_s26] sm:$0xff] %v1291_v24  ;;  %v1292_v25 = vsel %vm1286_vm13, %v1283_v20, %v1289_v23 }
 0x2db   : > { %1295 = vst [vmem:[%s251_s26 + $0x8] sm:$0xff] %v1292_v25 }
 0x2dc PF: > { %s16_s21 = sadd.s32 1, %s1470_s21  }
 0x2dd   : > { %p13_p4 = scmp.ge.s32.totalorder %s16_s21, 4  }
 0x2df   :  { %15 = sbr.rel (!%p13_p4) target bundleno = 1 (0x1), region = 74 }

</bundles_post_ra>
